<compile_context>
chip_gen: v5e
topology: v5e:2x2
jax: 0.10.0
libtpu: 0.0.40
codegen_flags: <defaults>
</compile_context>

<pallas_src>
import jax
import jax.numpy as jnp
from jax import lax
from jax.experimental import pallas as pl
from jax.experimental.pallas import tpu as pltpu


def cbow_kernel(ids_ref, embed_ref, wT_ref, bias_ref, out_ref):
    # ids_ref:   (TILE_B, C)  int32   token ids for this batch tile
    # embed_ref: (Vp, D)      f32     embedding table (vocab padded to 128)
    # wT_ref:    (D, Vp)      bf16    transposed nn.Linear weight (padded)
    # bias_ref:  (1, Vp)      f32     bias (padded)
    # out_ref:   (TILE_B, Vp) f32     lane-dense logits block
    tile_b, ctx = ids_ref.shape
    vp = embed_ref.shape[0]

    ids = ids_ref[...]                                          # (TILE_B, C)
    vocab_iota = lax.broadcasted_iota(jnp.int32, (tile_b, vp), 1)

    # Bag-of-words counts: counts[b, v] = #occurrences of token v in row b.
    # C is small and static -> unrolled VPU compares, no scalar gather loop.
    counts = jnp.zeros((tile_b, vp), jnp.float32)
    for c in range(ctx):
        counts = counts + (ids[:, c:c + 1] == vocab_iota).astype(jnp.float32)

    # Embedding-sum as an MXU matmul (exact in f32: counts are small ints).
    embeds = jnp.dot(counts, embed_ref[...],
                     preferred_element_type=jnp.float32)        # (TILE_B, D)

    # Linear projection in bf16 on the MXU, accumulate in f32, add f32 bias.
    logits = jnp.dot(embeds.astype(jnp.bfloat16), wT_ref[...],
                     preferred_element_type=jnp.float32) + bias_ref[...]
    out_ref[...] = logits.astype(out_ref.dtype)


def _round_up(x, m):
    return ((x + m - 1) // m) * m


def cbow_forward(inputs, labels, embed_table, linear_w, linear_b, *,
                 max_tile_b=128):
    """Forward pass of CBOW. `labels` are unused (matches the PyTorch module)."""
    del labels
    B, C = inputs.shape
    V, D = embed_table.shape

    # Batch tile: cap at 128 (fits v5e MXU rows; safe on v6e/v7x too).
    tile_b = min(max_tile_b, _round_up(B, 8))
    Bp = _round_up(B, tile_b)
    Vp = _round_up(V, 128)              # lane-dense output / weight columns

    # Pad operands (padding rows/cols are zeros; padded batch rows use token 0
    # and are sliced away below).
    ids_p = jnp.zeros((Bp, C), jnp.int32).at[:B].set(inputs.astype(jnp.int32))
    embed_p = jnp.zeros((Vp, D), jnp.float32).at[:V].set(
        embed_table.astype(jnp.float32))
    wT_p = jnp.zeros((D, Vp), jnp.bfloat16).at[:, :V].set(
        linear_w.T.astype(jnp.bfloat16))
    bias_p = jnp.zeros((1, Vp), jnp.float32).at[:, :V].set(
        linear_b.reshape(1, V).astype(jnp.float32))

    grid = (Bp // tile_b,)

    out = pl.pallas_call(
        cbow_kernel,
        out_shape=jax.ShapeDtypeStruct((Bp, Vp), jnp.float32),
        grid_spec=pltpu.PrefetchScalarGridSpec(
            num_scalar_prefetch=0,
            grid=grid,
            in_specs=[
                pl.BlockSpec((tile_b, C), lambda i: (i, 0)),   # ids tile
                pl.BlockSpec((Vp, D), lambda i: (0, 0)),       # embed table
                pl.BlockSpec((D, Vp), lambda i: (0, 0)),       # W^T (bf16)
                pl.BlockSpec((1, Vp), lambda i: (0, 0)),       # bias
            ],
            out_specs=pl.BlockSpec((tile_b, Vp), lambda i: (i, 0)),
        ),
        compiler_params=pltpu.CompilerParams(
            dimension_semantics=("parallel",)),                # megacore on v7x
    )(ids_p, embed_p, wT_p, bias_p)

    return out[:B, :V]


if __name__ == "__main__":
    vocab_size, embedding_dim = 64, 32
    batch, context = 8, 4

    key = jax.random.PRNGKey(0)
    k1, k2, k3, k4, k5 = jax.random.split(key, 5)

    # Deterministic synthetic parameters (shapes match nn.Embedding / nn.Linear).
    embed_table = jax.random.normal(k1, (vocab_size, embedding_dim), jnp.float32)
    bound = 1.0 / (embedding_dim ** 0.5)
    linear_w = jax.random.uniform(k2, (vocab_size, embedding_dim), jnp.float32,
                                  minval=-bound, maxval=bound)
    linear_b = jax.random.uniform(k3, (vocab_size,), jnp.float32,
                                  minval=-bound, maxval=bound)

    inputs = jax.random.randint(k4, (batch, context), 0, vocab_size, jnp.int32)
    labels = jax.random.randint(k5, (batch,), 0, vocab_size, jnp.int32)

    out = cbow_forward(inputs, labels, embed_table, linear_w, linear_b)
    out = jax.block_until_ready(out)

    # Pure-JAX f32 reference of the forward semantics. Tolerance accounts for
    # the bf16 projection matmul inside the kernel (f32 accumulation).
    ref = jnp.sum(embed_table[inputs], axis=1) @ linear_w.T + linear_b
    assert out.shape == (batch, vocab_size)
    assert jnp.allclose(out, ref, atol=1e-1, rtol=5e-2), "mismatch vs reference"

    print("KERNEL_OK")
</pallas_src>

<mosaic_0001>
module attributes {stable_mosaic.version = 11 : i64} {
  func.func @cbow_kernel(%arg0: i32, %arg1: memref<8x4xi32, #tpu.memory_space<vmem>>, %arg2: memref<128x32xf32, #tpu.memory_space<vmem>>, %arg3: memref<32x128xbf16, #tpu.memory_space<vmem>>, %arg4: memref<1x128xf32, #tpu.memory_space<vmem>>, %arg5: memref<8x128xf32, #tpu.memory_space<vmem>>) attributes {dimension_semantics = [#tpu.dimension_semantics<parallel>], iteration_bounds = array<i64: 1>, scalar_prefetch = 0 : i64, scratch_operands = 0 : i64, tpu.core_type = #tpu.core_type<tc>, window_params = [{transform_indices = @transform_0, window_bounds = array<i64: 8, 4>}, {pipeline_mode = #tpu.pipeline_mode<synchronous>, transform_indices = @transform_1, window_bounds = array<i64: 128, 32>}, {pipeline_mode = #tpu.pipeline_mode<synchronous>, transform_indices = @transform_2, window_bounds = array<i64: 32, 128>}, {pipeline_mode = #tpu.pipeline_mode<synchronous>, transform_indices = @transform_3, window_bounds = array<i64: 1, 128>}, {transform_indices = @transform_4, window_bounds = array<i64: 8, 128>}]} {
    %c0 = arith.constant 0 : index
    %c0_0 = arith.constant 0 : index
    %0 = vector.load %arg1[%c0, %c0_0] : memref<8x4xi32, #tpu.memory_space<vmem>>, vector<8x4xi32>
    %1 = tpu.iota {dimensions = array<i32: 1>} : vector<8x128xi32>
    %cst = arith.constant 0.000000e+00 : f32
    %2 = vector.broadcast %cst : f32 to vector<8x128xf32>
    %3 = vector.extract_strided_slice %0 {offsets = [0, 0], sizes = [8, 1], strides = [1, 1]} : vector<8x4xi32> to vector<8x1xi32>
    %4 = vector.broadcast %3 : vector<8x1xi32> to vector<8x128xi32>
    %5 = arith.cmpi eq, %4, %1 : vector<8x128xi32>
    %6 = arith.extui %5 : vector<8x128xi1> to vector<8x128xi32>
    %7 = arith.sitofp %6 : vector<8x128xi32> to vector<8x128xf32>
    %8 = arith.addf %2, %7 : vector<8x128xf32>
    %9 = vector.extract_strided_slice %0 {offsets = [0, 1], sizes = [8, 1], strides = [1, 1]} : vector<8x4xi32> to vector<8x1xi32>
    %10 = vector.broadcast %9 : vector<8x1xi32> to vector<8x128xi32>
    %11 = arith.cmpi eq, %10, %1 : vector<8x128xi32>
    %12 = arith.extui %11 : vector<8x128xi1> to vector<8x128xi32>
    %13 = arith.sitofp %12 : vector<8x128xi32> to vector<8x128xf32>
    %14 = arith.addf %8, %13 : vector<8x128xf32>
    %15 = vector.extract_strided_slice %0 {offsets = [0, 2], sizes = [8, 1], strides = [1, 1]} : vector<8x4xi32> to vector<8x1xi32>
    %16 = vector.broadcast %15 : vector<8x1xi32> to vector<8x128xi32>
    %17 = arith.cmpi eq, %16, %1 : vector<8x128xi32>
    %18 = arith.extui %17 : vector<8x128xi1> to vector<8x128xi32>
    %19 = arith.sitofp %18 : vector<8x128xi32> to vector<8x128xf32>
    %20 = arith.addf %14, %19 : vector<8x128xf32>
    %21 = vector.extract_strided_slice %0 {offsets = [0, 3], sizes = [8, 1], strides = [1, 1]} : vector<8x4xi32> to vector<8x1xi32>
    %22 = vector.broadcast %21 : vector<8x1xi32> to vector<8x128xi32>
    %23 = arith.cmpi eq, %22, %1 : vector<8x128xi32>
    %24 = arith.extui %23 : vector<8x128xi1> to vector<8x128xi32>
    %25 = arith.sitofp %24 : vector<8x128xi32> to vector<8x128xf32>
    %26 = arith.addf %20, %25 : vector<8x128xf32>
    %c0_1 = arith.constant 0 : index
    %c0_2 = arith.constant 0 : index
    %27 = vector.load %arg2[%c0_1, %c0_2] : memref<128x32xf32, #tpu.memory_space<vmem>>, vector<128x32xf32>
    %cst_3 = arith.constant dense<0.000000e+00> : vector<8x32xf32>
    %28 = tpu.matmul %26, %27, %cst_3 {dimension_numbers = #tpu.dot_dimension_numbers<[1], [0], [0], [1], [0, 0, 1, 1], [], []>} : vector<8x128xf32>, vector<128x32xf32>, vector<8x32xf32> -> vector<8x32xf32>
    %29 = arith.truncf %28 : vector<8x32xf32> to vector<8x32xbf16>
    %c0_4 = arith.constant 0 : index
    %c0_5 = arith.constant 0 : index
    %30 = vector.load %arg3[%c0_4, %c0_5] : memref<32x128xbf16, #tpu.memory_space<vmem>>, vector<32x128xbf16>
    %cst_6 = arith.constant dense<0.000000e+00> : vector<8x128xf32>
    %31 = tpu.matmul %29, %30, %cst_6 {dimension_numbers = #tpu.dot_dimension_numbers<[1], [0], [0], [1], [0, 0, 1, 1], [], []>} : vector<8x32xbf16>, vector<32x128xbf16>, vector<8x128xf32> -> vector<8x128xf32>
    %c0_7 = arith.constant 0 : index
    %c0_8 = arith.constant 0 : index
    %32 = vector.load %arg4[%c0_7, %c0_8] : memref<1x128xf32, #tpu.memory_space<vmem>>, vector<1x128xf32>
    %33 = vector.broadcast %32 : vector<1x128xf32> to vector<8x128xf32>
    %34 = arith.addf %31, %33 : vector<8x128xf32>
    %c0_9 = arith.constant 0 : index
    %c0_10 = arith.constant 0 : index
    %35 = vector.load %arg5[%c0_9, %c0_10] : memref<8x128xf32, #tpu.memory_space<vmem>>, vector<8x128xf32>
    tpu.vector_store %arg5[%c0_9, %c0_10], %34 {strides = array<i32>} : memref<8x128xf32, #tpu.memory_space<vmem>>, vector<8x128xf32>,
    return
  }
  func.func @transform_0(%arg0: i32) -> (i32, i32) {
    %c0_i32 = arith.constant 0 : i32
    %c0_i32_0 = arith.constant 0 : i32
    return %arg0, %c0_i32 : i32, i32
  }
  func.func @transform_1(%arg0: i32) -> (i32, i32) {
    %c0_i32 = arith.constant 0 : i32
    %c0_i32_0 = arith.constant 0 : i32
    %c0_i32_1 = arith.constant 0 : i32
    return %c0_i32, %c0_i32_0 : i32, i32
  }
  func.func @transform_2(%arg0: i32) -> (i32, i32) {
    %c0_i32 = arith.constant 0 : i32
    %c0_i32_0 = arith.constant 0 : i32
    %c0_i32_1 = arith.constant 0 : i32
    return %c0_i32, %c0_i32_0 : i32, i32
  }
  func.func @transform_3(%arg0: i32) -> (i32, i32) {
    %c0_i32 = arith.constant 0 : i32
    %c0_i32_0 = arith.constant 0 : i32
    %c0_i32_1 = arith.constant 0 : i32
    return %c0_i32, %c0_i32_0 : i32, i32
  }
  func.func @transform_4(%arg0: i32) -> (i32, i32) {
    %c0_i32 = arith.constant 0 : i32
    %c0_i32_0 = arith.constant 0 : i32
    return %arg0, %c0_i32 : i32, i32
  }
}

</mosaic_0001>

<bundles_post_ra>
// kernel: tpu_custom_call.1
= control target key start
LH: loop header
LB: loop body
LE: loop exit
PB: predicated region body
PF: predicated region fallthrough
CT: control target
= control target key end

     0   :  { %v194_v2 = vmov 0   ;;  %v195_v3 = vmov 2   ;;  %s288_s0 = inlined_call_operand.vmem [shape: s32[8,4], index: 0, kind: input, shape index: {}]   ;;  %s289_s1 = inlined_call_operand.vmem [shape: f32[128,32], index: 1, kind: input, shape index: {}]   ;;  %s290_s2 = inlined_call_operand.vmem [shape: bf16[32,128], index: 2, kind: input, shape index: {}]   ;;  %s291_s3 = inlined_call_operand.vmem [shape: f32[1,128], index: 3, kind: input, shape index: {}]   ;;  %s292_s4 = inlined_call_operand.hbm [shape: f32[8,128], index: 4, kind: output, shape index: {}]  }
   0x1   :  { %v19_v0 = vld [vmem:[%s288_s0] sm:$0xff]  ;;  %v65_v1 = vld [vmem:[%s289_s1 + $0x78] sm:$0xff]  ;;  %162 = vset.pattern.permute.xlu0 %v194_v2  ;;  %164 = vset.pattern.permute.xlu1 %v195_v3  ;;  %v64_v4 = vld [vmem:[%s289_s1 + $0x70] sm:$0xff] }
   0x2   :  { %23 = vperm.xlu0 %162, %v19_v0   ;;  %37 = vperm.xlu1 %164, %v19_v0  }
   0x3   :  { %66 = vmatpush.msra.mxu0 %v65_v1 }
   0x4   :  { %9 = vsyncpa [#allocation3], 0  ;;  %v63_v5 = vld [vmem:[%s289_s1 + $0x68] sm:$0xff]  ;;  %v62_v6 = vld [vmem:[%s289_s1 + $0x60] sm:$0xff]  ;;  %v196_v8 = vmov 1   ;;  %v197_v9 = vmov 3   ;;  %v20_v22 = vlaneseq }
   0x5   :  { %67 = vmatpush.msra.mxu0 %v64_v4  ;;  %v61_v7 = vld [vmem:[%s289_s1 + $0x58] sm:$0xff]  ;;  %v60_v10 = vld [vmem:[%s289_s1 + $0x50] sm:$0xff]  ;;  %v59_v11 = vld [vmem:[%s289_s1 + $0x48] sm:$0xff]  ;;  %v198_v28 = vmov 0.0   ;;  %vm107_vm4 = vcmask 261120   ;;  %s199_s26 = smov [#allocation2]  }
   0x6   :  { %v58_v12 = vld [vmem:[%s289_s1 + $0x40] sm:$0xff]  ;;  %v57_v13 = vld [vmem:[%s289_s1 + $0x38] sm:$0xff]  ;;  %v56_v14 = vld [vmem:[%s289_s1 + $0x30] sm:$0xff]  ;;  %v21_v25 = vand.u32 127, %v20_v22  ;;  %s130_s27 = sshll.u32 %s199_s26, 4  ;;  %s132_s30 = sshll.u32 %s292_s4, 4  ;;  %s131_s27 = int_to_ptr.vmem [resolvable:$true] %s130_s27  ;;  %s133_s30 = int_to_ptr.hbm [resolvable:$true] %s132_s30 }
   0x7   :  { %68 = vmatpush.msra.mxu0 %v63_v5  ;;  %v55_v15 = vld [vmem:[%s289_s1 + $0x28] sm:$0xff]  ;;  %v54_v16 = vld [vmem:[%s289_s1 + $0x20] sm:$0xff]  ;;  %v53_v17 = vld [vmem:[%s289_s1 + $0x18] sm:$0xff] }
   0x8   :  { %v52_v18 = vld [vmem:[%s289_s1 + $0x10] sm:$0xff]  ;;  %v51_v19 = vld [vmem:[%s289_s1 + $0x8] sm:$0xff]  ;;  %v50_v20 = vld [vmem:[%s289_s1] sm:$0xff] }
   0x9   :  { %69 = vmatpush.msra.mxu0 %v62_v6  ;;  %v155_v21 = vld [vmem:[%s290_s2 + $0x8] sm:$0xff]  ;;  %v154_v36 = vld [vmem:[%s290_s2] sm:$0xff] }
   0xa   :  { %163 = vset.pattern.permute.xlu0 %v196_v8  ;;  %165 = vset.pattern.permute.xlu1 %v197_v9  ;;  %v167_v39 = vld [vmem:[%s291_s3] ss:$0 sm:$0xff] }
   0xb   :  { %30 = vperm.xlu0 %163, %v19_v0   ;;  %44 = vperm.xlu1 %165, %v19_v0  }
   0xc   :  { %70 = vmatpush.msra.mxu0 %v61_v7  ;;  %117 = vmatpush.bf16.msra.mxu1 %v155_v21 }
   0xe   :  { %71 = vmatpush.msra.mxu0 %v60_v10 }
  0x10   :  { %72 = vmatpush.msra.mxu0 %v59_v11  ;;  %118 = vmatpush.bf16.msra.mxu1 %v154_v36 }
  0x12   :  { %73 = vmatpush.msra.mxu0 %v58_v12 }
  0x13   :  { %166 = vset.pattern.permute.xlu0 %v197_v9 }
  0x14   :  { %74 = vmatpush.msra.mxu0 %v57_v13 }
  0x16   :  { %75 = vmatpush.msra.mxu0 %v56_v14 }
  0x18   :  { %76 = vmatpush.msra.mxu0 %v55_v15 }
  0x1a   :  { %77 = vmatpush.msra.mxu0 %v54_v16 }
  0x1c   :  { %78 = vmatpush.msra.mxu0 %v53_v17 }
  0x1e   :  { %79 = vmatpush.msra.mxu0 %v52_v18 }
  0x20   :  { %80 = vmatpush.msra.mxu0 %v51_v19 }
  0x22   :  { %81 = vmatpush.msra.mxu0 %v50_v20 }
  0x74   :  { %v24_v23 = vpop.permute.xlu0 %23  ;;  %v38_v24 = vpop.permute.xlu1 %37 }
  0x75   :  { %vm25_vm0 = vcmp.eq.s32.totalorder %v24_v23, %v21_v25  ;;  %vm39_vm1 = vcmp.eq.s32.totalorder %v38_v24, %v21_v25 }
  0x76   :  { %v141_v29 = vsel %vm25_vm0, 1.0, %v198_v28  ;;  %v143_v32 = vsel %vm39_vm1, 1.0, %v198_v28 }
  0x7d   :  { %v31_v26 = vpop.permute.xlu0 %30  ;;  %v45_v27 = vpop.permute.xlu1 %44 }
  0x7e   :  { %vm32_vm2 = vcmp.eq.s32.totalorder %v31_v26, %v21_v25  ;;  %vm46_vm3 = vcmp.eq.s32.totalorder %v45_v27, %v21_v25 }
  0x7f   :  { %v142_v30 = vsel %vm32_vm2, 1.0, %v198_v28  ;;  %v144_v33 = vsel %vm46_vm3, 1.0, %v198_v28 }
  0x80   :  { %v35_v31 = vadd.f32 %v142_v30, %v141_v29 }
  0x82   :  { %v42_v34 = vadd.f32 %v143_v32, %v35_v31 }
  0x84   :  { %v49_v35 = vadd.f32 %v144_v33, %v42_v34 }
  0x86   :  { %82 = vmatmul.f32.vlgmr.msra.gmra.mxu0 %v49_v35 }
 0x103   :  { %v83_v37 = vpop.f32.mrf.mxu0 }
 0x104   :  { %v86_v38 = vpack.c.bf16 %v83_v37, %v83_v37 }
 0x106   :  { %153 = vmatmul.msk.bf16.vlgmr.msra.gmra.mxu1 %vm107_vm4, %v86_v38 }
 0x183   :  { %v120_v40 = vpop.f32.mrf.mxu1 }
 0x184   :  { %v121_v41 = vadd.f32 %v167_v39, %v120_v40 }
 0x186   :  { %124 = vst [vmem:[#allocation2] sm:$0xff] %v121_v41 }
 0x187   :  { %135 = dma.vmem_to_hbm [thread:$0]  %s131_s27, 128, %s133_s30, [#allocation3]  }
 0x18b   :  { %v122_v42 = vpop.f32.mrf.mxu1 }
 0x18c   :  { %192 = dma.done.wait [#allocation3], 128  }
 0x18d   :  { %193 = vsyncadd [#allocation3], 4294967168 }
 0x18e   :  { %140 = vsyncpa [#allocation3], 1 }

</bundles_post_ra>
